<compile_context>
chip_gen: v5e
topology: v5e:2x2
jax: 0.10.0
libtpu: 0.0.40
codegen_flags: <defaults>
</compile_context>

<pallas_src>
import functools

import jax
import jax.numpy as jnp
from jax.experimental import pallas as pl
from jax.experimental.pallas import tpu as pltpu

HIDDEN = 128   # hidden width of the PyTorch module
LANE = 128     # TPU lane width (padded head-output width)


def dueling_dqn_kernel(x_ref, w1_ref, wh_ref, b_ref, out_ref, *, out_lanes):
    mm_dtype = w1_ref.dtype   # f32 or bf16 (matmul operands only)

    # Packed bias row (always f32): [ b1 (128) | ba1|bv1 (256) | folded Q bias (128) ]
    b1 = b_ref[:, 0:HIDDEN]                                    # (1, 128)
    bh1 = b_ref[:, HIDDEN:3 * HIDDEN]                          # (1, 256)
    bq = b_ref[:, 3 * HIDDEN:3 * HIDDEN + LANE]                # (1, 128)

    # Packed weight slab (384, 256):
    #   rows [0:128)          -> fused head hidden layer [Wa1 | Wv1]     (128, 256)
    #   rows [128:384), :128  -> head-out (block-diag) @ combine matrix  (256, 128)
    wh1 = wh_ref[0:HIDDEN, :]                                  # (128, 256)
    wq = wh_ref[HIDDEN:3 * HIDDEN, 0:LANE]                     # (256, 128)

    x = x_ref[...].astype(mm_dtype)                            # (TB, state_dim)

    # shared = ReLU(x @ W1 + b1)      (bias add / ReLU kept in f32)
    shared = jnp.maximum(
        jnp.dot(x, w1_ref[...], preferred_element_type=jnp.float32) + b1, 0.0)

    # fused head hidden layer: [a_h | v_h] = ReLU(shared @ [Wa1|Wv1] + [ba1|bv1])
    h1 = jnp.maximum(
        jnp.dot(shared.astype(mm_dtype), wh1,
                preferred_element_type=jnp.float32) + bh1, 0.0)               # (TB, 256)

    # fused head output with the dueling combine folded into wq/bq:
    #   q[:, :action_dim] = V + A - mean(A), lanes >= action_dim are exact zeros.
    q = jnp.dot(h1.astype(mm_dtype), wq,
                preferred_element_type=jnp.float32) + bq                      # (TB, 128)

    # Narrow lane-dense store (out block is only `out_lanes` wide).
    out_ref[...] = q[:, :out_lanes].astype(out_ref.dtype)


def pack_params(params, action_dim, *, mm_dtype=jnp.float32):
    """Pack the 10 Linear tensors into (w1, weight_slab, bias_row).

    The dueling combine Q = V + A - mean(A) is affine in the head output h2,
    so it is folded into the head-output weights/bias here (zero in-kernel cost).
    """
    hidden = params["wa1"].shape[0]
    assert hidden == HIDDEN
    assert action_dim + 1 <= LANE, "action_dim too large for 128-lane head packing"

    # Fused head hidden layer weights: (128, 256) = [Wa1 | Wv1]
    wh1 = jnp.concatenate([params["wa1"], params["wv1"]], axis=1)

    # Head output layer, block-diagonal, padded to 128 output lanes: (256, 128)
    #   cols [0:action_dim) = advantage, col action_dim = value.
    wh2 = jnp.zeros((2 * hidden, LANE), jnp.float32)
    wh2 = wh2.at[:hidden, :action_dim].set(params["wa2"])
    wh2 = wh2.at[hidden:, action_dim:action_dim + 1].set(params["wv2"])
    bh2 = jnp.zeros((1, LANE), jnp.float32)
    bh2 = bh2.at[:, :action_dim].set(params["ba2"])
    bh2 = bh2.at[:, action_dim:action_dim + 1].set(params["bv2"])

    # Combine matrix C (128, 128): Q = h2 @ C with
    #   C[k, j] = [k == j] - [k < A]/A + [k == A]   for j < A, else 0.
    rows = jnp.arange(LANE)[:, None]
    cols = jnp.arange(LANE)[None, :]
    comb = ((rows == cols).astype(jnp.float32)
            - (rows < action_dim).astype(jnp.float32) / action_dim
            + (rows == action_dim).astype(jnp.float32))
    comb = comb * (cols < action_dim).astype(jnp.float32)

    wq = wh2 @ comb                      # (256, 128) — only first action_dim cols nonzero
    bq = bh2 @ comb                      # (1, 128)

    # Single weight slab (384, 256): wh1 in rows 0:128, wq in rows 128:384 / cols 0:128.
    w_slab = jnp.zeros((3 * hidden, 2 * hidden), jnp.float32)
    w_slab = w_slab.at[:hidden, :].set(wh1)
    w_slab = w_slab.at[hidden:, :LANE].set(wq)

    # Single bias row (1, 512) = [b1 | ba1 | bv1 | bq]; biases stay f32 always.
    b_slab = jnp.concatenate(
        [params["b1"], params["ba1"], params["bv1"], bq], axis=1)

    w1 = params["w1"]
    if mm_dtype != jnp.float32:          # bf16 matmul operands (v6e/v7x MXU-native)
        w1 = w1.astype(mm_dtype)
        w_slab = w_slab.astype(mm_dtype)
    return w1, w_slab, b_slab


def dueling_dqn_forward(x, packed, action_dim, *, block_b=1024):
    """Forward pass. `packed` = pack_params(params, action_dim) (done once)."""
    w1, w_slab, b_slab = packed
    B, state_dim = x.shape
    out_lanes = max(8, ((action_dim + 7) // 8) * 8)   # narrow padded output width

    # Batch tile: multiple of 8 (f32 sublane), capped at block_b, and capped at
    # ceil(B/2) so large batches always give >= 2 grid steps (v7x has 2 TCs).
    half = max(8, ((-(-B // 2)) + 7) // 8 * 8)
    tb = max(8, (min(block_b, half) // 8) * 8)
    b_pad = (-(-B // tb)) * tb
    if b_pad != B:
        x = jnp.pad(x, ((0, b_pad - B), (0, 0)))
    grid = (b_pad // tb,)

    kernel = functools.partial(dueling_dqn_kernel, out_lanes=out_lanes)
    q_padded = pl.pallas_call(
        kernel,
        out_shape=jax.ShapeDtypeStruct((b_pad, out_lanes), jnp.float32),
        grid=grid,
        in_specs=[
            pl.BlockSpec((tb, state_dim), lambda i: (i, 0)),     # x: tiled over B
            pl.BlockSpec(w1.shape, lambda i: (0, 0)),            # weights stay resident
            pl.BlockSpec(w_slab.shape, lambda i: (0, 0)),
            pl.BlockSpec(b_slab.shape, lambda i: (0, 0)),
        ],
        out_specs=pl.BlockSpec((tb, out_lanes), lambda i: (i, 0)),
        compiler_params=pltpu.CompilerParams(
            dimension_semantics=("parallel",)),                  # megacore on v7x
    )(x, w1, w_slab, b_slab)

    # Lane-dense kernel output -> logical (B, action_dim)
    return q_padded[:B, :action_dim]


def init_params(key, state_dim, action_dim, hidden=HIDDEN):
    # Deterministic synthetic init (PyTorch-style uniform(-1/sqrt(fan_in), ...)).
    def linear(k, fan_in, fan_out):
        kw, kb = jax.random.split(k)
        bound = 1.0 / jnp.sqrt(fan_in)
        # weight stored already transposed: (in_features, out_features)
        w = jax.random.uniform(kw, (fan_in, fan_out), jnp.float32, -bound, bound)
        b = jax.random.uniform(kb, (1, fan_out), jnp.float32, -bound, bound)
        return w, b

    k1, k2, k3, k4, k5 = jax.random.split(key, 5)
    w1, b1 = linear(k1, state_dim, hidden)
    wa1, ba1 = linear(k2, hidden, hidden)
    wa2, ba2 = linear(k3, hidden, action_dim)
    wv1, bv1 = linear(k4, hidden, hidden)
    wv2, bv2 = linear(k5, hidden, 1)
    return dict(w1=w1, b1=b1, wa1=wa1, ba1=ba1, wa2=wa2, ba2=ba2,
                wv1=wv1, bv1=bv1, wv2=wv2, bv2=bv2)


def reference_forward(x, p):
    shared = jnp.maximum(x @ p["w1"] + p["b1"], 0.0)
    adv = jnp.maximum(shared @ p["wa1"] + p["ba1"], 0.0) @ p["wa2"] + p["ba2"]
    val = jnp.maximum(shared @ p["wv1"] + p["bv1"], 0.0) @ p["wv2"] + p["bv2"]
    return val + adv - jnp.mean(adv, axis=1, keepdims=True)


if __name__ == "__main__":
    # CartPole-v1: state_dim = 4, action_dim = 2
    state_dim, action_dim, batch = 4, 2, 8

    key = jax.random.PRNGKey(0)
    kx, kp, kb = jax.random.split(key, 3)
    x = jax.random.normal(kx, (batch, state_dim), jnp.float32)
    params = init_params(kp, state_dim, action_dim)

    # f32 matmul path (folded combine only reorders f32 rounding).
    packed_f32 = pack_params(params, action_dim)
    q = jax.block_until_ready(dueling_dqn_forward(x, packed_f32, action_dim))
    q_ref = reference_forward(x, params)
    assert q.shape == (batch, action_dim)
    assert jnp.allclose(q, q_ref, atol=1e-4, rtol=1e-4)

    # Larger batch (non-multiple of tile): exercises padding + >=2 grid steps.
    xb = jax.random.normal(kb, (1000, state_dim), jnp.float32)
    qb = jax.block_until_ready(dueling_dqn_forward(xb, packed_f32, action_dim))
    qb_ref = reference_forward(xb, params)
    assert qb.shape == (1000, action_dim)
    assert jnp.allclose(qb, qb_ref, atol=1e-4, rtol=1e-4)

    # bf16 matmul-operand path (MXU-native on v5e/v6e/v7x); elementwise stays f32.
    packed_bf16 = pack_params(params, action_dim, mm_dtype=jnp.bfloat16)
    qh = jax.block_until_ready(dueling_dqn_forward(xb, packed_bf16, action_dim))
    assert qh.shape == (1000, action_dim)
    assert jnp.allclose(qh, qb_ref, atol=1e-1, rtol=1e-1)

    print("KERNEL_OK")
</pallas_src>

<mosaic_0001>
module attributes {stable_mosaic.version = 11 : i64} {
  func.func @dueling_dqn_kernel(%arg0: i32, %arg1: memref<8x4xf32, #tpu.memory_space<vmem>>, %arg2: memref<4x128xf32, #tpu.memory_space<vmem>>, %arg3: memref<384x256xf32, #tpu.memory_space<vmem>>, %arg4: memref<1x512xf32, #tpu.memory_space<vmem>>, %arg5: memref<8x8xf32, #tpu.memory_space<vmem>>) attributes {dimension_semantics = [#tpu.dimension_semantics<parallel>], iteration_bounds = array<i64: 1>, scalar_prefetch = 0 : i64, scratch_operands = 0 : i64, tpu.core_type = #tpu.core_type<tc>, window_params = [{transform_indices = @transform_0, window_bounds = array<i64: 8, 4>}, {pipeline_mode = #tpu.pipeline_mode<synchronous>, transform_indices = @transform_1, window_bounds = array<i64: 4, 128>}, {pipeline_mode = #tpu.pipeline_mode<synchronous>, transform_indices = @transform_2, window_bounds = array<i64: 384, 256>}, {pipeline_mode = #tpu.pipeline_mode<synchronous>, transform_indices = @transform_3, window_bounds = array<i64: 1, 512>}, {transform_indices = @transform_4, window_bounds = array<i64: 8, 8>}]} {
    %c0 = arith.constant 0 : index
    %c0_0 = arith.constant 0 : index
    %0 = vector.load %arg4[%c0, %c0_0] : memref<1x512xf32, #tpu.memory_space<vmem>>, vector<1x128xf32>
    %c0_1 = arith.constant 0 : index
    %c128 = arith.constant 128 : index
    %1 = vector.load %arg4[%c0_1, %c128] : memref<1x512xf32, #tpu.memory_space<vmem>>, vector<1x256xf32>
    %c0_2 = arith.constant 0 : index
    %c384 = arith.constant 384 : index
    %2 = vector.load %arg4[%c0_2, %c384] : memref<1x512xf32, #tpu.memory_space<vmem>>, vector<1x128xf32>
    %c0_3 = arith.constant 0 : index
    %c0_4 = arith.constant 0 : index
    %3 = vector.load %arg3[%c0_3, %c0_4] : memref<384x256xf32, #tpu.memory_space<vmem>>, vector<128x256xf32>
    %c128_5 = arith.constant 128 : index
    %c0_6 = arith.constant 0 : index
    %4 = vector.load %arg3[%c128_5, %c0_6] : memref<384x256xf32, #tpu.memory_space<vmem>>, vector<256x128xf32>
    %c0_7 = arith.constant 0 : index
    %c0_8 = arith.constant 0 : index
    %5 = vector.load %arg1[%c0_7, %c0_8] : memref<8x4xf32, #tpu.memory_space<vmem>>, vector<8x4xf32>
    %c0_9 = arith.constant 0 : index
    %c0_10 = arith.constant 0 : index
    %6 = vector.load %arg2[%c0_9, %c0_10] : memref<4x128xf32, #tpu.memory_space<vmem>>, vector<4x128xf32>
    %cst = arith.constant dense<0.000000e+00> : vector<8x128xf32>
    %7 = tpu.matmul %5, %6, %cst {dimension_numbers = #tpu.dot_dimension_numbers<[1], [0], [0], [1], [0, 0, 1, 1], [], []>} : vector<8x4xf32>, vector<4x128xf32>, vector<8x128xf32> -> vector<8x128xf32>
    %8 = vector.broadcast %0 : vector<1x128xf32> to vector<8x128xf32>
    %9 = arith.addf %7, %8 : vector<8x128xf32>
    %cst_11 = arith.constant 0.000000e+00 : f32
    %10 = vector.broadcast %cst_11 : f32 to vector<8x128xf32>
    %11 = arith.maximumf %9, %10 : vector<8x128xf32>
    %cst_12 = arith.constant dense<0.000000e+00> : vector<8x256xf32>
    %12 = tpu.matmul %11, %3, %cst_12 {dimension_numbers = #tpu.dot_dimension_numbers<[1], [0], [0], [1], [0, 0, 1, 1], [], []>} : vector<8x128xf32>, vector<128x256xf32>, vector<8x256xf32> -> vector<8x256xf32>
    %13 = vector.broadcast %1 : vector<1x256xf32> to vector<8x256xf32>
    %14 = arith.addf %12, %13 : vector<8x256xf32>
    %cst_13 = arith.constant 0.000000e+00 : f32
    %15 = vector.broadcast %cst_13 : f32 to vector<8x256xf32>
    %16 = arith.maximumf %14, %15 : vector<8x256xf32>
    %cst_14 = arith.constant dense<0.000000e+00> : vector<8x128xf32>
    %17 = tpu.matmul %16, %4, %cst_14 {dimension_numbers = #tpu.dot_dimension_numbers<[1], [0], [0], [1], [0, 0, 1, 1], [], []>} : vector<8x256xf32>, vector<256x128xf32>, vector<8x128xf32> -> vector<8x128xf32>
    %18 = vector.broadcast %2 : vector<1x128xf32> to vector<8x128xf32>
    %19 = arith.addf %17, %18 : vector<8x128xf32>
    %20 = vector.extract_strided_slice %19 {offsets = [0, 0], sizes = [8, 8], strides = [1, 1]} : vector<8x128xf32> to vector<8x8xf32>
    %c0_15 = arith.constant 0 : index
    %c0_16 = arith.constant 0 : index
    %21 = vector.load %arg5[%c0_15, %c0_16] : memref<8x8xf32, #tpu.memory_space<vmem>>, vector<8x8xf32>
    tpu.vector_store %arg5[%c0_15, %c0_16], %20 {strides = array<i32>} : memref<8x8xf32, #tpu.memory_space<vmem>>, vector<8x8xf32>,
    return
  }
  func.func @transform_0(%arg0: i32) -> (i32, i32) {
    %c0_i32 = arith.constant 0 : i32
    %c0_i32_0 = arith.constant 0 : i32
    return %arg0, %c0_i32 : i32, i32
  }
  func.func @transform_1(%arg0: i32) -> (i32, i32) {
    %c0_i32 = arith.constant 0 : i32
    %c0_i32_0 = arith.constant 0 : i32
    %c0_i32_1 = arith.constant 0 : i32
    return %c0_i32, %c0_i32_0 : i32, i32
  }
  func.func @transform_2(%arg0: i32) -> (i32, i32) {
    %c0_i32 = arith.constant 0 : i32
    %c0_i32_0 = arith.constant 0 : i32
    %c0_i32_1 = arith.constant 0 : i32
    return %c0_i32, %c0_i32_0 : i32, i32
  }
  func.func @transform_3(%arg0: i32) -> (i32, i32) {
    %c0_i32 = arith.constant 0 : i32
    %c0_i32_0 = arith.constant 0 : i32
    %c0_i32_1 = arith.constant 0 : i32
    return %c0_i32, %c0_i32_0 : i32, i32
  }
  func.func @transform_4(%arg0: i32) -> (i32, i32) {
    %c0_i32 = arith.constant 0 : i32
    %c0_i32_0 = arith.constant 0 : i32
    return %arg0, %c0_i32 : i32, i32
  }
}

</mosaic_0001>

<bundles_post_ra>
// kernel: tpu_custom_call.1
= control target key start
LH: loop header
LB: loop body
LE: loop exit
PB: predicated region body
PF: predicated region fallthrough
CT: control target
= control target key end

     0   :  { %9 = vsyncpa [#allocation3], 0  ;;  %s354_s0 = inlined_call_operand.vmem [shape: f32[8,4], index: 0, kind: input, shape index: {}]   ;;  %s355_s1 = inlined_call_operand.vmem [shape: f32[4,128], index: 1, kind: input, shape index: {}]   ;;  %s356_s2 = inlined_call_operand.hbm [shape: f32[384,256], index: 2, kind: input, shape index: {}]   ;;  %s357_s3 = inlined_call_operand.vmem [shape: f32[1,512], index: 3, kind: input, shape index: {}]   ;;  %s358_s4 = inlined_call_operand.hbm [shape: f32[8,8], index: 4, kind: output, shape index: {}]  }
   0x1   :  { %10 = vsyncpa [#allocation4], 0  ;;  %s19_s17 = sshll.u32 %s356_s2, 4  ;;  %s304_s18 = smov [#allocation2]   ;;  %s20_s17 = int_to_ptr.hbm [resolvable:$true] %s19_s17 }
   0x2   :  { %s21_s19 = sshll.u32 %s304_s18, 4  ;;  %s305_s20 = smov 256   ;;  %s22_s19 = int_to_ptr.vmem [resolvable:$true] %s21_s19 }
   0x3   :  { %s306_s21 = smov 16  }
   0x4   :  { %27 = dma.hbm_to_vmem [thread:$0]  %s20_s17, 12288, %s22_s19, [#allocation3], %s305_s20, %s305_s20, %s306_s21  }
   0x5   :  { %300 = dma.done.wait [#allocation3], 12288  }
   0x6   :  { %301 = vsyncadd [#allocation3], 4294955008  ;;  %vm110_vm0 = vcmask 1043456   ;;  %vm106_vm1 = vcmask 31744   ;;  %v102_v0 = vld [vmem:[%s355_s1] sm:$0xf] }
   0x7   :  { %v101_v1 = vld [vmem:[%s354_s0] sm:$0xff]  ;;  %v67_v2 = vld [vmem:[#allocation2 + $0xf0] sm:$0xff]  ;;  %244 = vmatpush.msk.msra.mxu0 %vm110_vm0, %v102_v0  ;;  %v68_v3 = vld [vmem:[#allocation2 + $0xf8] sm:$0xff]  ;;  %s307_s29 = smov [#allocation5]   ;;  %s234_s7 = sshll.u32 %s358_s4, 4  ;;  %vm225_vm2 = vcmask 64512   ;;  %s235_s7 = int_to_ptr.hbm [resolvable:$true] %s234_s7 }
   0x8   :  { %140 = vmatpush.msra.mxu1 %v67_v2  ;;  %v65_v4 = vld [vmem:[#allocation2 + $0xe0] sm:$0xff]  ;;  %v66_v5 = vld [vmem:[#allocation2 + $0xe8] sm:$0xff]  ;;  %245 = vmatmul.msk.f32.vlgmr.msra.gmra.mxu0 %vm106_vm1, %v101_v1  ;;  %v63_v6 = vld [vmem:[#allocation2 + $0xd0] sm:$0xff]  ;;  %s232_s30 = sshll.u32 %s307_s29, 4  ;;  %s233_s30 = int_to_ptr.vmem [resolvable:$true] %s232_s30 }
   0x9   :  { %160 = vmatpush.msra.mxu2 %v68_v3  ;;  %v64_v7 = vld [vmem:[#allocation2 + $0xd8] sm:$0xff]  ;;  %v61_v8 = vld [vmem:[#allocation2 + $0xc0] sm:$0xff]  ;;  %v62_v9 = vld [vmem:[#allocation2 + $0xc8] sm:$0xff] }
   0xa   :  { %141 = vmatpush.msra.mxu1 %v65_v4  ;;  %v59_v10 = vld [vmem:[#allocation2 + $0xb0] sm:$0xff]  ;;  %v60_v11 = vld [vmem:[#allocation2 + $0xb8] sm:$0xff]  ;;  %v57_v12 = vld [vmem:[#allocation2 + $0xa0] sm:$0xff] }
   0xb   :  { %161 = vmatpush.msra.mxu2 %v66_v5  ;;  %v58_v13 = vld [vmem:[#allocation2 + $0xa8] sm:$0xff]  ;;  %v55_v14 = vld [vmem:[#allocation2 + $0x90] sm:$0xff]  ;;  %v56_v15 = vld [vmem:[#allocation2 + $0x98] sm:$0xff] }
   0xc   :  { %142 = vmatpush.msra.mxu1 %v63_v6  ;;  %v53_v16 = vld [vmem:[#allocation2 + $0x80] sm:$0xff]  ;;  %v54_v17 = vld [vmem:[#allocation2 + $0x88] sm:$0xff]  ;;  %v51_v18 = vld [vmem:[#allocation2 + $0x70] sm:$0xff] }
   0xd   :  { %162 = vmatpush.msra.mxu2 %v64_v7  ;;  %v52_v19 = vld [vmem:[#allocation2 + $0x78] sm:$0xff]  ;;  %v49_v20 = vld [vmem:[#allocation2 + $0x60] sm:$0xff]  ;;  %v50_v21 = vld [vmem:[#allocation2 + $0x68] sm:$0xff] }
   0xe   :  { %143 = vmatpush.msra.mxu1 %v61_v8  ;;  %v47_v22 = vld [vmem:[#allocation2 + $0x50] sm:$0xff]  ;;  %v48_v23 = vld [vmem:[#allocation2 + $0x58] sm:$0xff]  ;;  %v45_v24 = vld [vmem:[#allocation2 + $0x40] sm:$0xff] }
   0xf   :  { %163 = vmatpush.msra.mxu2 %v62_v9  ;;  %v46_v25 = vld [vmem:[#allocation2 + $0x48] sm:$0xff]  ;;  %v43_v26 = vld [vmem:[#allocation2 + $0x30] sm:$0xff]  ;;  %v44_v27 = vld [vmem:[#allocation2 + $0x38] sm:$0xff] }
  0x10   :  { %144 = vmatpush.msra.mxu1 %v59_v10  ;;  %v41_v28 = vld [vmem:[#allocation2 + $0x20] sm:$0xff]  ;;  %v42_v29 = vld [vmem:[#allocation2 + $0x28] sm:$0xff]  ;;  %v39_v30 = vld [vmem:[#allocation2 + $0x10] sm:$0xff] }
  0x11   :  { %164 = vmatpush.msra.mxu2 %v60_v11  ;;  %v40_v31 = vld [vmem:[#allocation2 + $0x18] sm:$0xff]  ;;  %v37_v32 = vld [vmem:[#allocation2] sm:$0xff]  ;;  %v38_v33 = vld [vmem:[#allocation2 + $0x8] sm:$0xff] }
  0x12   :  { %145 = vmatpush.msra.mxu1 %v57_v12  ;;  %v84_v34 = vld [vmem:[#allocation2 + $0x1f0] sm:$0xff]  ;;  %v83_v35 = vld [vmem:[#allocation2 + $0x1e0] sm:$0xff] }
  0x13   :  { %165 = vmatpush.msra.mxu2 %v58_v13  ;;  %185 = vmatpush.msra.mxu3 %v84_v34  ;;  %v100_v36 = vld [vmem:[#allocation2 + $0x2f0] sm:$0xff]  ;;  %v99_v38 = vld [vmem:[#allocation2 + $0x2e0] sm:$0xff] }
  0x14   :  { %146 = vmatpush.msra.mxu1 %v55_v14  ;;  %v82_v37 = vld [vmem:[#allocation2 + $0x1d0] sm:$0xff]  ;;  %205 = vmatpush.msrb.mxu0 %v100_v36  ;;  %v81_v40 = vld [vmem:[#allocation2 + $0x1c0] sm:$0xff] }
  0x15   :  { %166 = vmatpush.msra.mxu2 %v56_v15  ;;  %186 = vmatpush.msra.mxu3 %v83_v35  ;;  %v98_v39 = vld [vmem:[#allocation2 + $0x2d0] sm:$0xff]  ;;  %v97_v41 = vld [vmem:[#allocation2 + $0x2c0] sm:$0xff] }
  0x16   :  { %147 = vmatpush.msra.mxu1 %v53_v16  ;;  %206 = vmatpush.msrb.mxu0 %v99_v38  ;;  %v80_v42 = vld [vmem:[#allocation2 + $0x1b0] sm:$0xff]  ;;  %v79_v44 = vld [vmem:[#allocation2 + $0x1a0] sm:$0xff] }
  0x17   :  { %167 = vmatpush.msra.mxu2 %v54_v17  ;;  %187 = vmatpush.msra.mxu3 %v82_v37  ;;  %v96_v43 = vld [vmem:[#allocation2 + $0x2b0] sm:$0xff]  ;;  %v95_v45 = vld [vmem:[#allocation2 + $0x2a0] sm:$0xff] }
  0x18   :  { %148 = vmatpush.msra.mxu1 %v51_v18  ;;  %207 = vmatpush.msrb.mxu0 %v98_v39  ;;  %v78_v46 = vld [vmem:[#allocation2 + $0x190] sm:$0xff]  ;;  %v77_v48 = vld [vmem:[#allocation2 + $0x180] sm:$0xff] }
  0x19   :  { %168 = vmatpush.msra.mxu2 %v52_v19  ;;  %188 = vmatpush.msra.mxu3 %v81_v40  ;;  %v94_v47 = vld [vmem:[#allocation2 + $0x290] sm:$0xff]  ;;  %v93_v49 = vld [vmem:[#allocation2 + $0x280] sm:$0xff] }
  0x1a   :  { %149 = vmatpush.msra.mxu1 %v49_v20  ;;  %208 = vmatpush.msrb.mxu0 %v97_v41  ;;  %v76_v50 = vld [vmem:[#allocation2 + $0x170] sm:$0xff]  ;;  %v75_v52 = vld [vmem:[#allocation2 + $0x160] sm:$0xff] }
  0x1b   :  { %169 = vmatpush.msra.mxu2 %v50_v21  ;;  %189 = vmatpush.msra.mxu3 %v80_v42  ;;  %v92_v51 = vld [vmem:[#allocation2 + $0x270] sm:$0xff]  ;;  %v91_v53 = vld [vmem:[#allocation2 + $0x260] sm:$0xff] }
  0x1c   :  { %150 = vmatpush.msra.mxu1 %v47_v22  ;;  %209 = vmatpush.msrb.mxu0 %v96_v43  ;;  %v74_v54 = vld [vmem:[#allocation2 + $0x150] sm:$0xff]  ;;  %v73_v55 = vld [vmem:[#allocation2 + $0x140] sm:$0xff] }
  0x1d   :  { %170 = vmatpush.msra.mxu2 %v48_v23  ;;  %190 = vmatpush.msra.mxu3 %v79_v44  ;;  %v72_v56 = vld [vmem:[#allocation2 + $0x130] sm:$0xff]  ;;  %v250_v57 = vld [vmem:[%s357_s3] ss:$0 sm:$0xff]  ;;  %v35_v6 = vld [vmem:[%s357_s3 + $0x1] sm:$0x3] }
  0x1e   :  { %151 = vmatpush.msra.mxu1 %v45_v24  ;;  %210 = vmatpush.msrb.mxu0 %v95_v45  ;;  %v71_v61 = vld [vmem:[#allocation2 + $0x120] sm:$0xff]  ;;  %v90_v62 = vld [vmem:[#allocation2 + $0x250] sm:$0xff]  ;;  %v136_v7 = vperm.slane %v35_v6, 0  ;;  %v137_v11 = vperm.slane %v35_v6, 1 }
  0x1f   :  { %171 = vmatpush.msra.mxu2 %v46_v25  ;;  %191 = vmatpush.msra.mxu3 %v78_v46  ;;  %v70_v63 = vld [vmem:[#allocation2 + $0x110] sm:$0xff]  ;;  %v89_v0 = vld [vmem:[#allocation2 + $0x240] sm:$0xff] }
  0x20   :  { %152 = vmatpush.msra.mxu1 %v43_v26  ;;  %211 = vmatpush.msrb.mxu0 %v94_v47  ;;  %v69_v1 = vld [vmem:[#allocation2 + $0x100] sm:$0xff]  ;;  %v88_v2 = vld [vmem:[#allocation2 + $0x230] sm:$0xff] }
  0x21   :  { %172 = vmatpush.msra.mxu2 %v44_v27  ;;  %192 = vmatpush.msra.mxu3 %v77_v48  ;;  %v87_v3 = vld [vmem:[#allocation2 + $0x220] sm:$0xff]  ;;  %v86_v4 = vld [vmem:[#allocation2 + $0x210] sm:$0xff] }
  0x22   :  { %153 = vmatpush.msra.mxu1 %v41_v28  ;;  %212 = vmatpush.msrb.mxu0 %v93_v49  ;;  %v85_v5 = vld [vmem:[#allocation2 + $0x200] sm:$0xff] }
  0x23   :  { %173 = vmatpush.msra.mxu2 %v42_v29  ;;  %193 = vmatpush.msra.mxu3 %v76_v50  ;;  %v251_v15 = vld [vmem:[%s357_s3 + $0x3] ss:$0 sm:$0xff] }
  0x24   :  { %154 = vmatpush.msra.mxu1 %v39_v30  ;;  %213 = vmatpush.msrb.mxu0 %v92_v51 }
  0x25   :  { %174 = vmatpush.msra.mxu2 %v40_v31  ;;  %194 = vmatpush.msra.mxu3 %v75_v52 }
  0x26   :  { %155 = vmatpush.msra.mxu1 %v37_v32  ;;  %214 = vmatpush.msrb.mxu0 %v91_v53 }
  0x27   :  { %175 = vmatpush.msra.mxu2 %v38_v33  ;;  %195 = vmatpush.msra.mxu3 %v74_v54 }
  0x28   :  { %215 = vmatpush.msrb.mxu0 %v90_v62 }
  0x29   :  { %196 = vmatpush.msra.mxu3 %v73_v55 }
  0x2a   :  { %216 = vmatpush.msrb.mxu0 %v89_v0 }
  0x2b   :  { %197 = vmatpush.msra.mxu3 %v72_v56 }
  0x2c   :  { %217 = vmatpush.msrb.mxu0 %v88_v2 }
  0x2d   :  { %198 = vmatpush.msra.mxu3 %v71_v61 }
  0x2e   :  { %218 = vmatpush.msrb.mxu0 %v87_v3 }
  0x2f   :  { %199 = vmatpush.msra.mxu3 %v70_v63 }
  0x30   :  { %219 = vmatpush.msrb.mxu0 %v86_v4 }
  0x31   :  { %200 = vmatpush.msra.mxu3 %v69_v1 }
  0x32   :  { %220 = vmatpush.msrb.mxu0 %v85_v5 }
  0x85   :  { %v131_v58 = vpop.f32.mrf.mxu0 }
  0x86   :  { %v132_v59 = vadd.f32 %v250_v57, %v131_v58 }
  0x88   :  { %v134_v60 = vmax.f32 %v132_v59, 0.0 }
  0x8a   :  { %156 = vmatmul.f32.vlgmr.msra.gmra.mxu1 %v134_v60  ;;  %176 = vmatmul.f32.vlgmr.msra.gmra.mxu2 %v134_v60 }
 0x107   :  { %v157_v8 = vpop.f32.mrf.mxu1 }
 0x108   :  { %v158_v9 = vadd.f32 %v157_v8, %v136_v7 }
 0x10a   :  { %v180_v10 = vmax.f32 %v158_v9, 0.0 }
 0x10c   :  { %201 = vmatmul.f32.vlgmr.msra.gmra.mxu3 %v180_v10 }
 0x10d   :  { %v177_v12 = vpop.f32.mrf.mxu2 }
 0x10e   :  { %v178_v13 = vadd.f32 %v177_v12, %v137_v11 }
 0x110   :  { %v181_v14 = vmax.f32 %v178_v13, 0.0 }
 0x112   :  { %221 = vmatmul.f32.vlgmr.msrb.gmra.mxu0 %v181_v14 }
 0x18f   :  { %v202_v16 = vpop.f32.mrf.mxu3  ;;  %v222_v18 = vpop.f32.mrf.mxu0 }
 0x190   :  { %v203_v17 = vadd.f32 %v251_v15, %v202_v16 }
 0x192   :  { %v223_v19 = vadd.f32 %v222_v18, %v203_v17 }
 0x194   :  { %226 = vst.msk [vmem:[#allocation5] sm:$0xff] %vm225_vm2, %v223_v19 }
 0x195   :  { %237 = dma.vmem_to_hbm [thread:$0]  %s233_s30, 128, %s235_s7, [#allocation4]  }
 0x196   :  { %302 = dma.done.wait [#allocation4], 128  }
 0x197   :  { %303 = vsyncadd [#allocation4], 4294967168 }
 0x198   :  { %242 = vsyncpa [#allocation3], 1 }
 0x199   :  { %243 = vsyncpa [#allocation4], 1 }

</bundles_post_ra>
